<compile_context>
chip_gen: v7x
topology: tpu7x:2x2x1
jax: 0.10.0
libtpu: 0.0.40
codegen_flags: <defaults>
</compile_context>

<pallas_src>
import functools

import jax
import jax.numpy as jnp
from jax.experimental import pallas as pl
from jax.experimental.pallas import tpu as pltpu

EPS = 1e-5
NEG_SLOPE = 0.2


def _round_up(x, m):
    return (x + m - 1) // m * m


def _divisors(n):
    out = set()
    i = 1
    while i * i <= n:
        if n % i == 0:
            out.add(i)
            out.add(n // i)
        i += 1
    return out


def _vmem_limit_bytes():
    """Generation-aware VMEM budget: 75% of physical VMEM.

    v5e/v6e (128 MiB) -> 96 MiB, v7x (64 MiB) -> 48 MiB.
    """
    cap = 0
    try:
        cap = int(pltpu.get_tpu_info().vmem_capacity_bytes)
    except Exception:
        cap = 0
    if cap <= 0:
        cap = 64 * 1024 * 1024
    return cap * 3 // 4


# ----------------------------- kernel 1 --------------------------------------
def conv_stats_kernel(x_ref, w_ref, y_ref, sum_ref, m2_ref, *,
                      ka_h, ka_w, ws, wo, th):
    """Strided conv as ka_h*ka_w shifted matmuls + per-block batch statistics.

    x_ref  : ((th+ka_h)*ws, Kc)     s2d input rows for this block (compute dtype)
    w_ref  : (ka_h*ka_w, Kc, C_pad) reorganized conv weights (compute dtype)
    y_ref  : (th*ws, C_pad)         conv output raster (rows with col >= wo are junk)
    sum_ref: (1, C_pad)             partial sum over the valid rows (f32)
    m2_ref : (1, C_pad)             partial sum-of-squares around the block mean (f32)
    """
    ly = th * ws
    x = x_ref[...]
    acc = jnp.zeros((ly, y_ref.shape[-1]), jnp.float32)
    for ah in range(ka_h):
        for aw in range(ka_w):
            start = ah * ws + aw
            acc = acc + jnp.dot(x[start:start + ly, :],
                                w_ref[ah * ka_w + aw],
                                preferred_element_type=jnp.float32)
    y_ref[...] = acc.astype(y_ref.dtype)

    # Batch statistics over valid raster rows only (raster column < wo).
    ridx = jax.lax.broadcasted_iota(jnp.int32, acc.shape, 0)
    valid = (ridx % ws) < wo
    n_valid = th * wo
    s = jnp.sum(jnp.where(valid, acc, 0.0), axis=0, keepdims=True)
    mean_b = s * (1.0 / n_valid)
    d = jnp.where(valid, acc - mean_b, 0.0)
    sum_ref[...] = s
    m2_ref[...] = jnp.sum(d * d, axis=0, keepdims=True)


# ----------------------------- kernel 2 --------------------------------------
def bn_apply_kernel(y_ref, scale_ref, shift_ref, o_ref):
    """Streaming BatchNorm application: out = y * scale + shift (f32 math)."""
    y = y_ref[...].astype(jnp.float32)
    o_ref[...] = (y * scale_ref[...] + shift_ref[...]).astype(o_ref.dtype)


# ------------------------------ wrapper --------------------------------------
def conv_unit_forward(x_nchw, weight, bias, gamma, beta, *,
                      stride=2, padding=1, compute_dtype=jnp.bfloat16,
                      bn_rows_target=2048):
    del bias  # exactly cancelled by training-mode BN mean subtraction (see header)

    N, C_in, H, W = x_nchw.shape
    C_out, C_in_w, KH, KW = weight.shape
    assert C_in_w == C_in
    s = stride
    H_out = (H + 2 * padding - KH) // s + 1
    W_out = (W + 2 * padding - KW) // s + 1
    KA_h = -(-KH // s)          # ceil(KH / s)
    KA_w = -(-KW // s)
    Kc = s * s * C_in

    # Lane padding of the output channels: only pad up to 128 lanes when C_out
    # is large enough that lane-dense stores beat the extra HBM bytes.
    C_pad = C_out if C_out < 64 else _round_up(C_out, 128)

    cdt = jnp.dtype(compute_dtype)
    dt_in = cdt.itemsize
    vmem_limit = _vmem_limit_bytes()
    budget = int(vmem_limit * 0.8)

    # ---- wrapper glue: layout only, no duplicated compute, no im2col --------
    x = jnp.transpose(x_nchw, (0, 2, 3, 1)).astype(jnp.float32)
    x = jnp.where(x >= 0, x, NEG_SLOPE * x)          # LeakyReLU applied ONCE
    Hp, Wp = H + 2 * padding, W + 2 * padding
    Hp_e, Wp_e = _round_up(Hp, s), _round_up(Wp, s)
    xp = jnp.pad(x, ((0, 0), (padding, Hp_e - Hp + padding),
                     (padding, Wp_e - Wp + padding), (0, 0)))
    # Space-to-depth by the stride: conv(KH,KW,s) over xp == conv(KA_h,KA_w,1) over xs.
    Hs, Ws = Hp_e // s, Wp_e // s
    xs = xp.reshape(N, Hs, s, Ws, s, C_in).transpose(0, 1, 3, 2, 4, 5)
    xs = xs.reshape(N, Hs, Ws, Kc).astype(cdt)
    rows_needed = H_out + KA_h                       # halo rows for the last block
    if rows_needed > Hs:
        xs = jnp.pad(xs, ((0, 0), (0, rows_needed - Hs), (0, 0), (0, 0)))

    # Kernel-1 row tile: largest divisor of H_out that fits the VMEM budget and
    # (when possible) leaves >= 2 grid steps for megacore sharding.
    def _k1_bytes(th_):
        lb_ = (th_ + KA_h) * Ws
        ly_ = th_ * Ws
        b = 2 * lb_ * Kc * dt_in                      # xs block, double buffered
        b += 2 * KA_h * KA_w * Kc * C_pad * dt_in     # weights (constant block)
        b += 2 * ly_ * C_pad * dt_in                  # conv-out block
        b += ly_ * C_pad * 4 + 2 * ly_ * Kc * dt_in   # f32 acc + shifted-window copies
        b += 4 * 4 * C_pad                            # partial stats
        return int(b * 1.25)                          # compiler-temporary fudge

    th = 1
    for cand in sorted(_divisors(H_out), reverse=True):
        if _k1_bytes(cand) > budget:
            continue
        if N * (H_out // cand) >= 2 or cand == 1:
            th = cand
            break
    nHb = H_out // th
    NB = N * nHb
    LB = (th + KA_h) * Ws
    LY = th * Ws

    # Per-block row gather (adds only the KA_h-row halo ~ (th+KA_h)/th duplication).
    if nHb == 1:
        xs_t = xs[:, :th + KA_h].reshape(NB, LB, Kc)
    else:
        row_idx = jnp.arange(nHb)[:, None] * th + jnp.arange(th + KA_h)[None, :]
        xs_t = xs[:, row_idx].reshape(NB, LB, Kc)

    # PyTorch weight (O, C, KH, KW) -> zero-pad kernel to a multiple of the
    # stride -> (KA_h*KA_w, s*s*C_in, C_pad) matching the s2d channel order.
    w = weight.astype(jnp.float32)
    KH_p, KW_p = KA_h * s, KA_w * s
    if (KH_p, KW_p) != (KH, KW):
        w = jnp.pad(w, ((0, 0), (0, 0), (0, KH_p - KH), (0, KW_p - KW)))
    w2 = w.reshape(C_out, C_in, KA_h, s, KA_w, s)
    w2 = w2.transpose(2, 4, 3, 5, 1, 0).reshape(KA_h * KA_w, Kc, C_out)
    if C_pad != C_out:
        w2 = jnp.pad(w2, ((0, 0), (0, 0), (0, C_pad - C_out)))
    w2 = w2.astype(cdt)

    # ---- kernel 1: shifted-matmul conv + per-block batch statistics ---------
    kernel1 = functools.partial(conv_stats_kernel, ka_h=KA_h, ka_w=KA_w,
                                ws=Ws, wo=W_out, th=th)
    conv_out, psum, pm2 = pl.pallas_call(
        kernel1,
        grid_spec=pltpu.PrefetchScalarGridSpec(
            num_scalar_prefetch=0,
            grid=(NB,),
            in_specs=[
                pl.BlockSpec((None, LB, Kc), lambda i: (i, 0, 0)),
                # Constant-index block: the pipeline fetches it only once.
                # TODO(synk): pipeline_mode=pl.Buffered(1) would also drop the
                # unused second VMEM buffer for this block.
                pl.BlockSpec((KA_h * KA_w, Kc, C_pad), lambda i: (0, 0, 0)),
            ],
            out_specs=[
                pl.BlockSpec((None, LY, C_pad), lambda i: (i, 0, 0)),
                pl.BlockSpec((None, 1, C_pad), lambda i: (i, 0, 0)),
                pl.BlockSpec((None, 1, C_pad), lambda i: (i, 0, 0)),
            ],
        ),
        out_shape=(
            jax.ShapeDtypeStruct((NB, LY, C_pad), cdt),
            jax.ShapeDtypeStruct((NB, 1, C_pad), jnp.float32),
            jax.ShapeDtypeStruct((NB, 1, C_pad), jnp.float32),
        ),
        compiler_params=pltpu.CompilerParams(
            dimension_semantics=("parallel",),
            vmem_limit_bytes=vmem_limit,
        ),
    )(xs_t, w2)

    # ---- tiny wrapper math: Chan et al. combine of the per-block partials ---
    sums = psum[:, 0, :C_out]                          # (NB, C_out)
    m2s = pm2[:, 0, :C_out]
    n_b = float(th * W_out)
    m_total = float(N * H_out * W_out)
    mean_b = sums / n_b
    mean = jnp.sum(sums, axis=0) / m_total
    m2 = jnp.sum(m2s, axis=0) + n_b * jnp.sum((mean_b - mean) ** 2, axis=0)
    var = m2 / m_total                                 # biased (PyTorch BN forward)
    inv = jax.lax.rsqrt(var + EPS)
    scale = gamma.astype(jnp.float32) * inv
    shift = beta.astype(jnp.float32) - mean * scale
    if C_pad != C_out:
        scale = jnp.pad(scale, (0, C_pad - C_out))
        shift = jnp.pad(shift, (0, C_pad - C_out))
    scale_row = scale.reshape(1, C_pad)
    shift_row = shift.reshape(1, C_pad)

    # ---- kernel 2: streaming y*scale + shift with its own (large) row tile --
    R2 = NB * LY
    y2 = conv_out.reshape(R2, C_pad)
    row_bytes = 2 * C_pad * (dt_in + 4) + 64           # dbl-buffered read + f32 write
    tm2_target = max(8, min(bn_rows_target, budget // max(row_bytes, 1)))
    if R2 >= 16:
        tm2_target = min(tm2_target, R2 // 2)          # keep >= 2 steps (megacore)
    tm2 = R2                                           # legal fallback: single block
    for d in sorted(_divisors(R2), reverse=True):
        if d <= tm2_target and d % 8 == 0:
            tm2 = d
            break
    n2 = R2 // tm2

    out_flat = pl.pallas_call(
        bn_apply_kernel,
        grid_spec=pltpu.PrefetchScalarGridSpec(
            num_scalar_prefetch=0,
            grid=(n2,),
            in_specs=[
                pl.BlockSpec((tm2, C_pad), lambda i: (i, 0)),
                pl.BlockSpec((1, C_pad), lambda i: (0, 0)),
                pl.BlockSpec((1, C_pad), lambda i: (0, 0)),
            ],
            out_specs=pl.BlockSpec((tm2, C_pad), lambda i: (i, 0)),
        ),
        out_shape=jax.ShapeDtypeStruct((R2, C_pad), jnp.float32),
        compiler_params=pltpu.CompilerParams(
            dimension_semantics=("parallel",),
            vmem_limit_bytes=vmem_limit,
        ),
    )(y2, scale_row, shift_row)

    # Drop invalid raster columns / padded lanes, back to NCHW.
    out = out_flat.reshape(N, nHb, th, Ws, C_pad)[:, :, :, :W_out, :C_out]
    out = out.reshape(N, H_out, W_out, C_out)
    return jnp.transpose(out, (0, 3, 1, 2))


# ----------------------------- reference -------------------------------------
def _reference(x_nchw, weight, bias, gamma, beta):
    """Plain-JAX reference matching PyTorch semantics (training-mode BN)."""
    x = jnp.transpose(x_nchw, (0, 2, 3, 1)).astype(jnp.float32)
    act = jnp.where(x >= 0, x, NEG_SLOPE * x)
    w_hwio = jnp.transpose(weight, (2, 3, 1, 0)).astype(jnp.float32)
    conv = jax.lax.conv_general_dilated(
        act, w_hwio, window_strides=(2, 2), padding=((1, 1), (1, 1)),
        dimension_numbers=("NHWC", "HWIO", "NHWC")) + bias.reshape(1, 1, 1, -1)
    mean = conv.mean(axis=(0, 1, 2))
    var = conv.var(axis=(0, 1, 2))  # biased, like PyTorch BN forward
    out = (conv - mean) * jax.lax.rsqrt(var + EPS) * gamma + beta
    return jnp.transpose(out, (0, 3, 1, 2))


if __name__ == "__main__":
    N, C_in, C_out, H, W = 2, 4, 8, 16, 16

    key = jax.random.PRNGKey(0)
    kx, kw, kb = jax.random.split(key, 3)
    x = jax.random.normal(kx, (N, C_in, H, W), dtype=jnp.float32)
    weight = jax.random.normal(kw, (C_out, C_in, 4, 4), dtype=jnp.float32) * 0.1
    bias = jax.random.normal(kb, (C_out,), dtype=jnp.float32) * 0.1
    gamma = jnp.ones((C_out,), dtype=jnp.float32)   # PyTorch BatchNorm2d default init
    beta = jnp.zeros((C_out,), dtype=jnp.float32)

    ref = _reference(x, weight, bias, gamma, beta)

    # Exact-precision path (f32 operands) -- tight tolerance vs. f32 reference.
    out_f32 = jax.block_until_ready(
        conv_unit_forward(x, weight, bias, gamma, beta,
                          compute_dtype=jnp.float32))
    assert out_f32.shape == (N, C_out, H // 2, W // 2), out_f32.shape
    assert jnp.allclose(out_f32, ref, atol=1e-4, rtol=1e-4), \
        float(jnp.abs(out_f32 - ref).max())

    # Default fast path (bf16 operands, f32 MXU accumulation) -- tolerance set
    # for bf16 input quantization of the conv operands.
    out_bf16 = jax.block_until_ready(
        conv_unit_forward(x, weight, bias, gamma, beta))
    assert out_bf16.shape == (N, C_out, H // 2, W // 2), out_bf16.shape
    assert jnp.allclose(out_bf16, ref, atol=5e-2, rtol=5e-2), \
        float(jnp.abs(out_bf16 - ref).max())

    print("KERNEL_OK")
</pallas_src>

<mosaic_0001>
module attributes {stable_mosaic.version = 11 : i64} {
  func.func @conv_stats_kernel(%arg0: i32, %arg1: memref<1x90x16xf32, #tpu.memory_space<vmem>>, %arg2: memref<4x16x8xf32, #tpu.memory_space<vmem>>, %arg3: memref<1x72x8xf32, #tpu.memory_space<vmem>>, %arg4: memref<1x1x8xf32, #tpu.memory_space<vmem>>, %arg5: memref<1x1x8xf32, #tpu.memory_space<vmem>>) attributes {dimension_semantics = [#tpu.dimension_semantics<parallel>], iteration_bounds = array<i64: 2>, scalar_prefetch = 0 : i64, scratch_operands = 0 : i64, tpu.core_type = #tpu.core_type<tc>, window_params = [{transform_indices = @transform_0, window_bounds = array<i64: 1, 90, 16>}, {pipeline_mode = #tpu.pipeline_mode<synchronous>, transform_indices = @transform_1, window_bounds = array<i64: 4, 16, 8>}, {transform_indices = @transform_2, window_bounds = array<i64: 1, 72, 8>}, {transform_indices = @transform_3, window_bounds = array<i64: 1, 1, 8>}, {transform_indices = @transform_4, window_bounds = array<i64: 1, 1, 8>}]} {
    %c0 = arith.constant 0 : index
    %c0_0 = arith.constant 0 : index
    %c0_1 = arith.constant 0 : index
    %0 = vector.load %arg1[%c0, %c0_0, %c0_1] : memref<1x90x16xf32, #tpu.memory_space<vmem>>, vector<1x90x16xf32>
    %1 = vector.shape_cast %0 : vector<1x90x16xf32> to vector<90x16xf32>
    %cst = arith.constant 0.000000e+00 : f32
    %2 = vector.broadcast %cst : f32 to vector<72x8xf32>
    %3 = vector.extract_strided_slice %1 {offsets = [0, 0], sizes = [72, 16], strides = [1, 1]} : vector<90x16xf32> to vector<72x16xf32>
    %c0_2 = arith.constant 0 : index
    %c0_3 = arith.constant 0 : index
    %c0_4 = arith.constant 0 : index
    %4 = vector.load %arg2[%c0_2, %c0_3, %c0_4] : memref<4x16x8xf32, #tpu.memory_space<vmem>>, vector<1x16x8xf32>
    %5 = vector.shape_cast %4 : vector<1x16x8xf32> to vector<16x8xf32>
    %cst_5 = arith.constant dense<0.000000e+00> : vector<72x8xf32>
    %6 = tpu.matmul %3, %5, %cst_5 {dimension_numbers = #tpu.dot_dimension_numbers<[1], [0], [0], [1], [0, 0, 1, 1], [], []>} : vector<72x16xf32>, vector<16x8xf32>, vector<72x8xf32> -> vector<72x8xf32>
    %7 = arith.addf %2, %6 : vector<72x8xf32>
    %8 = vector.extract_strided_slice %1 {offsets = [1, 0], sizes = [72, 16], strides = [1, 1]} : vector<90x16xf32> to vector<72x16xf32>
    %c1 = arith.constant 1 : index
    %c0_6 = arith.constant 0 : index
    %c0_7 = arith.constant 0 : index
    %9 = vector.load %arg2[%c1, %c0_6, %c0_7] : memref<4x16x8xf32, #tpu.memory_space<vmem>>, vector<1x16x8xf32>
    %10 = vector.shape_cast %9 : vector<1x16x8xf32> to vector<16x8xf32>
    %cst_8 = arith.constant dense<0.000000e+00> : vector<72x8xf32>
    %11 = tpu.matmul %8, %10, %cst_8 {dimension_numbers = #tpu.dot_dimension_numbers<[1], [0], [0], [1], [0, 0, 1, 1], [], []>} : vector<72x16xf32>, vector<16x8xf32>, vector<72x8xf32> -> vector<72x8xf32>
    %12 = arith.addf %7, %11 : vector<72x8xf32>
    %13 = vector.extract_strided_slice %1 {offsets = [9, 0], sizes = [72, 16], strides = [1, 1]} : vector<90x16xf32> to vector<72x16xf32>
    %c2 = arith.constant 2 : index
    %c0_9 = arith.constant 0 : index
    %c0_10 = arith.constant 0 : index
    %14 = vector.load %arg2[%c2, %c0_9, %c0_10] : memref<4x16x8xf32, #tpu.memory_space<vmem>>, vector<1x16x8xf32>
    %15 = vector.shape_cast %14 : vector<1x16x8xf32> to vector<16x8xf32>
    %cst_11 = arith.constant dense<0.000000e+00> : vector<72x8xf32>
    %16 = tpu.matmul %13, %15, %cst_11 {dimension_numbers = #tpu.dot_dimension_numbers<[1], [0], [0], [1], [0, 0, 1, 1], [], []>} : vector<72x16xf32>, vector<16x8xf32>, vector<72x8xf32> -> vector<72x8xf32>
    %17 = arith.addf %12, %16 : vector<72x8xf32>
    %18 = vector.extract_strided_slice %1 {offsets = [10, 0], sizes = [72, 16], strides = [1, 1]} : vector<90x16xf32> to vector<72x16xf32>
    %c3 = arith.constant 3 : index
    %c0_12 = arith.constant 0 : index
    %c0_13 = arith.constant 0 : index
    %19 = vector.load %arg2[%c3, %c0_12, %c0_13] : memref<4x16x8xf32, #tpu.memory_space<vmem>>, vector<1x16x8xf32>
    %20 = vector.shape_cast %19 : vector<1x16x8xf32> to vector<16x8xf32>
    %cst_14 = arith.constant dense<0.000000e+00> : vector<72x8xf32>
    %21 = tpu.matmul %18, %20, %cst_14 {dimension_numbers = #tpu.dot_dimension_numbers<[1], [0], [0], [1], [0, 0, 1, 1], [], []>} : vector<72x16xf32>, vector<16x8xf32>, vector<72x8xf32> -> vector<72x8xf32>
    %22 = arith.addf %17, %21 : vector<72x8xf32>
    %c0_15 = arith.constant 0 : index
    %c0_16 = arith.constant 0 : index
    %c0_17 = arith.constant 0 : index
    %23 = vector.load %arg3[%c0_15, %c0_16, %c0_17] : memref<1x72x8xf32, #tpu.memory_space<vmem>>, vector<1x72x8xf32>
    %24 = vector.shape_cast %23 : vector<1x72x8xf32> to vector<72x8xf32>
    %25 = vector.shape_cast %22 : vector<72x8xf32> to vector<1x72x8xf32>
    tpu.vector_store %arg3[%c0_15, %c0_16, %c0_17], %25 {strides = array<i32>} : memref<1x72x8xf32, #tpu.memory_space<vmem>>, vector<1x72x8xf32>,
    %26 = tpu.iota {dimensions = array<i32: 0>} : vector<72x8xi32>
    %c9_i32 = arith.constant 9 : i32
    %c0_i32 = arith.constant 0 : i32
    %27 = arith.cmpi eq, %c9_i32, %c0_i32 : i32
    %c1_i32 = arith.constant 1 : i32
    %28 = arith.select %27, %c1_i32, %c9_i32 : i32
    %29 = vector.broadcast %28 : i32 to vector<72x8xi32>
    %30 = arith.remsi %26, %29 : vector<72x8xi32>
    %c0_i32_18 = arith.constant 0 : i32
    %31 = vector.broadcast %c0_i32_18 : i32 to vector<72x8xi32>
    %32 = arith.cmpi ne, %30, %31 : vector<72x8xi32>
    %c0_i32_19 = arith.constant 0 : i32
    %33 = vector.broadcast %c0_i32_19 : i32 to vector<72x8xi32>
    %34 = arith.cmpi slt, %30, %33 : vector<72x8xi32>
    %c0_i32_20 = arith.constant 0 : i32
    %35 = arith.cmpi slt, %28, %c0_i32_20 : i32
    %36 = vector.broadcast %35 : i1 to vector<72x8xi1>
    %37 = vector.broadcast %36 : vector<72x8xi1> to vector<72x8xi1>
    %38 = arith.xori %34, %37 : vector<72x8xi1>
    %39 = arith.andi %38, %32 : vector<72x8xi1>
    %40 = vector.broadcast %28 : i32 to vector<72x8xi32>
    %41 = arith.addi %30, %40 : vector<72x8xi32>
    %42 = arith.select %39, %41, %30 : vector<72x8xi1>, vector<72x8xi32>
    %c8_i32 = arith.constant 8 : i32
    %43 = vector.broadcast %c8_i32 : i32 to vector<72x8xi32>
    %44 = arith.cmpi slt, %42, %43 : vector<72x8xi32>
    %cst_21 = arith.constant 0.000000e+00 : f32
    %45 = vector.broadcast %cst_21 : f32 to vector<72x8xf32>
    %46 = arith.select %44, %22, %45 : vector<72x8xi1>, vector<72x8xf32>
    %cst_22 = arith.constant dense<0.000000e+00> : vector<8xf32>
    %47 = vector.multi_reduction <add>, %46, %cst_22 [0] : vector<72x8xf32> to vector<8xf32>
    %48 = vector.shape_cast %47 : vector<8xf32> to vector<1x8xf32>
    %cst_23 = arith.constant 1.562500e-02 : f32
    %49 = vector.broadcast %cst_23 : f32 to vector<1x8xf32>
    %50 = arith.mulf %48, %49 : vector<1x8xf32>
    %51 = vector.broadcast %50 : vector<1x8xf32> to vector<72x8xf32>
    %52 = arith.subf %22, %51 : vector<72x8xf32>
    %cst_24 = arith.constant 0.000000e+00 : f32
    %53 = vector.broadcast %cst_24 : f32 to vector<72x8xf32>
    %54 = arith.select %44, %52, %53 : vector<72x8xi1>, vector<72x8xf32>
    %c0_25 = arith.constant 0 : index
    %c0_26 = arith.constant 0 : index
    %c0_27 = arith.constant 0 : index
    %55 = vector.load %arg4[%c0_25, %c0_26, %c0_27] : memref<1x1x8xf32, #tpu.memory_space<vmem>>, vector<1x1x8xf32>
    %56 = vector.shape_cast %55 : vector<1x1x8xf32> to vector<1x8xf32>
    %57 = vector.shape_cast %48 : vector<1x8xf32> to vector<1x1x8xf32>
    tpu.vector_store %arg4[%c0_25, %c0_26, %c0_27], %57 {strides = array<i32>} : memref<1x1x8xf32, #tpu.memory_space<vmem>>, vector<1x1x8xf32>,
    %58 = arith.mulf %54, %54 : vector<72x8xf32>
    %cst_28 = arith.constant dense<0.000000e+00> : vector<8xf32>
    %59 = vector.multi_reduction <add>, %58, %cst_28 [0] : vector<72x8xf32> to vector<8xf32>
    %60 = vector.shape_cast %59 : vector<8xf32> to vector<1x8xf32>
    %c0_29 = arith.constant 0 : index
    %c0_30 = arith.constant 0 : index
    %c0_31 = arith.constant 0 : index
    %61 = vector.load %arg5[%c0_29, %c0_30, %c0_31] : memref<1x1x8xf32, #tpu.memory_space<vmem>>, vector<1x1x8xf32>
    %62 = vector.shape_cast %61 : vector<1x1x8xf32> to vector<1x8xf32>
    %63 = vector.shape_cast %60 : vector<1x8xf32> to vector<1x1x8xf32>
    tpu.vector_store %arg5[%c0_29, %c0_30, %c0_31], %63 {strides = array<i32>} : memref<1x1x8xf32, #tpu.memory_space<vmem>>, vector<1x1x8xf32>,
    return
  }
  func.func @transform_0(%arg0: i32) -> (i32, i32, i32) {
    %c0_i32 = arith.constant 0 : i32
    %c0_i32_0 = arith.constant 0 : i32
    %c0_i32_1 = arith.constant 0 : i32
    return %arg0, %c0_i32, %c0_i32_0 : i32, i32, i32
  }
  func.func @transform_1(%arg0: i32) -> (i32, i32, i32) {
    %c0_i32 = arith.constant 0 : i32
    %c0_i32_0 = arith.constant 0 : i32
    %c0_i32_1 = arith.constant 0 : i32
    %c0_i32_2 = arith.constant 0 : i32
    return %c0_i32, %c0_i32_0, %c0_i32_1 : i32, i32, i32
  }
  func.func @transform_2(%arg0: i32) -> (i32, i32, i32) {
    %c0_i32 = arith.constant 0 : i32
    %c0_i32_0 = arith.constant 0 : i32
    %c0_i32_1 = arith.constant 0 : i32
    return %arg0, %c0_i32, %c0_i32_0 : i32, i32, i32
  }
  func.func @transform_3(%arg0: i32) -> (i32, i32, i32) {
    %c0_i32 = arith.constant 0 : i32
    %c0_i32_0 = arith.constant 0 : i32
    %c0_i32_1 = arith.constant 0 : i32
    return %arg0, %c0_i32, %c0_i32_0 : i32, i32, i32
  }
  func.func @transform_4(%arg0: i32) -> (i32, i32, i32) {
    %c0_i32 = arith.constant 0 : i32
    %c0_i32_0 = arith.constant 0 : i32
    %c0_i32_1 = arith.constant 0 : i32
    return %arg0, %c0_i32, %c0_i32_0 : i32, i32, i32
  }
}

</mosaic_0001>

<bundles_post_ra>
// kernel: tpu_custom_call.1
= control target key start
LH: loop header
LB: loop body
LE: loop exit
PB: predicated region body
PF: predicated region fallthrough
CT: control target
= control target key end

     0   :  { %10 = vsyncpa [#allocation3], 0  ;;  %s2326_s0 = inlined_call_operand.vmem [shape: f32[2,90,16], index: 0, kind: input, shape index: {}]   ;;  %s2327_s1 = inlined_call_operand.vmem [shape: f32[4,16,8], index: 1, kind: input, shape index: {}]   ;;  %s2328_s2 = inlined_call_operand.vmem [shape: f32[2,72,8], index: 2, kind: output, shape index: {0}]   ;;  %s2329_s3 = inlined_call_operand.hbm [shape: f32[2,1,8], index: 3, kind: output, shape index: {1}]   ;;  %s2330_s4 = inlined_call_operand.hbm [shape: f32[2,1,8], index: 4, kind: output, shape index: {2}]  }
   0x1   :  { %12 = vsyncpa [#allocation3 + $0x1], 0 }
   0x2   :  { %13 = vsyncpa [#allocation5], 0 }
   0x3   :  { %15 = vsyncpa [#allocation5 + $0x1], 0  ;;  %s1682_s15 = smov 0   ;;  %s1684_s16 = smov 0  }
   0x4   :  { %s1686_s17 = smov 0   ;;  %s1688_s18 = smov 0  }
   0x5 LB: > { %s1703_s19 = sadd.s32 4294967295, %s1650_s18   ;;  %s1212_s20 = sadd.s32 4294967294, %s1650_s18   ;;  %s1650_s18 = sphi %s1688_s18, %s2372_s18   ;;  %s1646_s17 = sphi %s1686_s17, %s2371_s17   ;;  %s1642_s16 = sphi %s1684_s16, %s2370_s16   ;;  %s1638_s15 = sphi %s1682_s15, %s2369_s15  }
   0x6   : > { %s1707_s21 = sadd.s32 1, %s1650_s18   ;;  %s101_s22 = sadd.s32 1, %s1646_s17 }
   0x7   : > { %s98_s23 = ssub.s32 %s1650_s18, %s1707_s21  ;;  %p111_p0 = scmp.ne.s32.totalorder %s1646_s17, %s1642_s16 }
   0x8   : > { %p99_p1 = scmp.eq.s32.totalorder %s98_s23, 0  ;;  %p112_p2 = scmp.eq.s32.totalorder %s1703_s19, 1 }
   0x9   : > { %p117_p3 = scmp.ne.s32.totalorder %s1642_s16, %s1638_s15  ;;  %p118_p4 = scmp.eq.s32.totalorder %s1212_s20, 1 }
   0xa   : > { %s1718_s24 = scalar_select %p99_p1, %s1646_s17, %s101_s22  }
   0xb   : > { %p1720_p5 = por %p112_p2, %p111_p0  ;;  %p1724_p6 = por %p118_p4, %p117_p3 }
   0xc   : > { %p1215_p7 = scmp.ge.s32.totalorder %s1650_s18, 1  ;;  %p173_p8 = scmp.lt.s32.totalorder %s1650_s18, 3 }
   0xe   : > { %p174_p9 = pnand %p1215_p7, %p173_p8 }
   0xf   : > { %v1218_v0 = vld [vmem:[%s2327_s1 + $0x10] sm:$0xff] (!%p174_p9)  ;;  %v1219_v1 = vld [vmem:[%s2327_s1 + $0x18] sm:$0xff] (!%p174_p9)  ;;  %v1238_v2 = vld [vmem:[%s2327_s1 + $0x20] sm:$0xff] (!%p174_p9)  ;;  %v1652_v3 = vmov (!%p174_p9), 0.0|0.0   ;;  %p207_p10 = scmp.lt.s32.totalorder (!%p174_p9), %s1703_s19, 1  ;;  %vm1653_vm0 = vmmov (!%p174_p9), 0  }
  0x10   : > { %177 = sbr.rel (%p174_p9) target bundleno = 392 (0x188), region = 28  ;;  %1432 = vmatprep.subr.bf16.mxu1 (!%p174_p9), %v1652_v3  ;;  %1438 = vmatprep.subr.bf16.mxu0 (!%p174_p9), %v1652_v3  ;;  %v1433_v4 = vpack.c.bf16 (!%p174_p9), %v1219_v1, %v1218_v0  ;;  %v1239_v5 = vld [vmem:[%s2327_s1 + $0x28] sm:$0xff] (!%p174_p9)  ;;  %v1654_v7 = vmov (!%p174_p9), 0.0   ;;  %v228_v8 = vld [vmem:[%s2327_s1] sm:$0xff] (!%p174_p9)  ;;  %v1249_v10 = vld [vmem:[%s2327_s1 + $0x30] sm:$0xff] (!%p174_p9)  ;;  %vm243_vm1 = vcmask (!%p174_p9), 1046528   ;;  %v817_v1 = vlaneseq (!%p174_p9) }
  0x11   : > { %v1439_v6 = vpack.c.bf16 (!%p174_p9), %v1239_v5, %v1238_v2  ;;  %1312 = vmatprep.mubr.msk.f32.mxu1 (!%p174_p9), %vm1653_vm0, %v1654_v7  ;;  %1374 = vmatprep.mubr.msk.f32.mxu0 (!%p174_p9), %vm1653_vm0, %v1654_v7  ;;  %v229_v9 = vld [vmem:[%s2327_s1 + $0x8] sm:$0xff] (!%p174_p9)  ;;  %v1250_v11 = vld [vmem:[%s2327_s1 + $0x38] sm:$0xff] (!%p174_p9)  ;;  %vm263_vm2 = vcmask (!%p174_p9), 130048   ;;  %vm650_vm3 = vcmask (!%p174_p9), 1045504   ;;  %vm807_vm12 = vcmask (!%p174_p9), 64512   ;;  %s1655_s27 = smov (!%p174_p9), [#allocation2]  }
  0x12   : > { %1434 = vmatpush3.bf16.msra.mxu1 (!%p174_p9), %v1433_v4  ;;  %v1436_v14 = vpack.c.bf16 (!%p174_p9), %v229_v9, %v228_v8  ;;  %v1442_v19 = vpack.c.bf16 (!%p174_p9), %v1250_v11, %v1249_v10  ;;  %v818_v2 = vshrl.u32 (!%p174_p9), %v817_v1, 7  ;;  %s1560_s28 = sshll.u32 (!%p174_p9), %s1655_s27, 4  ;;  %s1561_s28 = int_to_ptr.vmem [resolvable:$false] %s1560_s28 }
  0x13   : > { %1440 = vmatpush3.bf16.msra.mxu0 (!%p174_p9), %v1439_v6  ;;  %1435 = vmatprep.subr.bf16.mxu1 (!%p174_p9), %v1652_v3  ;;  %s1562_s29 = scalar_lea.vmem (!%p174_p9), %s1561_s28, 32 }
  0x14   : > { %1441 = vmatprep.subr.bf16.mxu0 (!%p174_p9), %v1652_v3  ;;  %v1954_v3 = vmul.u32.u64.low (!%p174_p9), 3817748708, %v818_v2  ;;  %v1955_v4 = vmul.u32.u64.high 3817748708, %v818_v2, %v1954_v3  ;;  %v819_v5 = vadd.s32 (!%p174_p9), 8, %v818_v2  ;;  %v820_v6 = vadd.s32 (!%p174_p9), 16, %v818_v2 }
  0x16   : > { %v1957_v8 = vmul.u32.u64.low (!%p174_p9), 3817748708, %v819_v5  ;;  %v1958_v9 = vmul.u32.u64.high 3817748708, %v819_v5, %v1957_v8  ;;  %v1960_v10 = vmul.u32.u64.low (!%p174_p9), 3817748708, %v820_v6  ;;  %v1961_v11 = vmul.u32.u64.high 3817748708, %v820_v6, %v1960_v10 }
  0x17   : > { %s1748_s9 = scalar_select %p207_p10, %s1703_s19, 1 }
  0x19   : > { %s1489_s10 = smul.u32 96, %s1748_s9 }
  0x1a   : > { %s1490_s5 = smul.u32 72, %s1748_s9  ;;  %s2204_s9 = sand.u32 1, %s1642_s16  }
  0x1b   : > { %s1766_s30 = scalar_lea.vmem %s2326_s0, %s1489_s10  ;;  %s1260_s10 = sshll.u32 %s1703_s19, 4 }
  0x1c   : > { %v1769_v12 = vld [vmem:[%s1766_s30] sm:$0xff]  ;;  %v1772_v13 = vld [vmem:[%s1766_s30 + $0x8] sm:$0xff]  ;;  %v1775_v15 = vld [vmem:[%s1766_s30 + $0x10] sm:$0xff]  ;;  %s2011_s8 = scalar_lea.vmem %s2328_s2, %s1490_s5  ;;  %s200_s11 = scalar_lea.vmem [#allocation2], %s2204_s9 }
  0x1d   : > { %v244_v16 = vrot.slane %v1769_v12, 1  ;;  %v245_v17 = vrot.slane %v1772_v13, 1  ;;  %v247_v18 = vrot.slane %v1775_v15, 1  ;;  %v1781_v20 = vld [vmem:[%s1766_s30 + $0x18] sm:$0xff]  ;;  %v1785_v22 = vld [vmem:[%s1766_s30 + $0x20] sm:$0xff]  ;;  %v1798_v27 = vld [vmem:[%s1766_s30 + $0x28] sm:$0xff]  ;;  %s2213_s20 = scalar_lea.hbm %s2329_s3, %s1260_s10 }
  0x1e   : > { %v249_v21 = vrot.slane %v1781_v20, 1  ;;  %v251_v26 = vrot.slane %v1785_v22, 1  ;;  %v253_v29 = vrot.slane %v1798_v27, 1  ;;  %v1809_v30 = vld [vmem:[%s1766_s30 + $0x30] sm:$0xff]  ;;  %v1820_v33 = vld [vmem:[%s1766_s30 + $0x38] sm:$0xff]  ;;  %v1831_v36 = vld [vmem:[%s1766_s30 + $0x40] sm:$0xff] }
  0x1f   : > { %v246_v23 = vsel %vm243_vm1, %v244_v16, %v245_v17  ;;  %v248_v24 = vsel %vm243_vm1, %v245_v17, %v247_v18  ;;  %v255_v32 = vrot.slane %v1809_v30, 1  ;;  %v257_v35 = vrot.slane %v1820_v33, 1  ;;  %v1842_v39 = vld [vmem:[%s1766_s30 + $0x48] sm:$0xff]  ;;  %v1853_v42 = vld [vmem:[%s1766_s30 + $0x50] sm:$0xff]  ;;  %s1091_s12 = sshll.u32 %s200_s11, 4  ;;  %s1072_s22 = scalar_lea.sflag [#allocation3], %s2204_s9  ;;  %s2215_s12 = int_to_ptr.vmem [resolvable:$true] %s1091_s12 }
  0x20   : > { %1313 = vmatmul.mubr.msk.f32.vlgmr.msra.gmra.mrb[0].mxu1 %vm263_vm2, %v246_v23  ;;  %1375 = vmatmul.mubr.msk.f32.vlgmr.msra.gmra.mrb[0].mxu0 %vm263_vm2, %v248_v24  ;;  %v250_v25 = vsel %vm243_vm1, %v247_v18, %v249_v21  ;;  %v252_v28 = vsel %vm243_vm1, %v249_v21, %v251_v26  ;;  %v254_v31 = vsel %vm243_vm1, %v251_v26, %v253_v29  ;;  %v259_v38 = vrot.slane %v1831_v36, 1  ;;  %s1556_s23 = scalar_lea.vmem %s2215_s12, 16  ;;  %p1563_p0 = scmp.lt.s32.totalorder %s2215_s12, %s1561_s28 }
  0x21   : > { %1437 = vmatpush3.bf16.msra.mxu1 %v1436_v14  ;;  %1443 = vmatpush3.bf16.msra.mxu0 %v1442_v19  ;;  %v256_v34 = vsel %vm243_vm1, %v253_v29, %v255_v32  ;;  %v258_v37 = vsel %vm243_vm1, %v255_v32, %v257_v35  ;;  %v261_v41 = vrot.slane %v1842_v39, 1  ;;  %v524_v44 = vrot.slane %v1853_v42, 1  ;;  %p1557_p11 = scmp.ne.s32.totalorder %s2215_s12, %s1556_s23  ;;  %p1564_p1 = scmp.lt.s32.totalorder %s1562_s29, %s1556_s23 }
  0x22   : > { %1315 = vmatprep.mubr.msk.f32.mxu1 %vm1653_vm0, %v1654_v7  ;;  %1377 = vmatprep.mubr.msk.f32.mxu0 %vm1653_vm0, %v1654_v7  ;;  %v260_v40 = vsel %vm243_vm1, %v257_v35, %v259_v38  ;;  %v651_v45 = vrot.slane %v1772_v13, 2  ;;  %v652_v46 = vrot.slane %v1775_v15, 2  ;;  %v654_v49 = vrot.slane %v1781_v20, 2 }
  0x23   : > { %v262_v43 = vsel %vm243_vm1, %v259_v38, %v261_v41  ;;  %v525_v47 = vsel %vm243_vm1, %v261_v41, %v524_v44  ;;  %v656_v51 = vrot.slane %v1785_v22, 2  ;;  %v658_v53 = vrot.slane %v1798_v27, 2  ;;  %p1558_p12 = pnand %p1557_p11, %p1720_p5  ;;  %p1565_p2 = por %p1564_p1, %p1563_p0 }
  0x24   : > { %1316 = vmatmul.mubr.msk.f32.gmra.mrb[2].mxu1 %vm263_vm2, %v248_v24  ;;  %1378 = vmatmul.mubr.msk.f32.gmra.mrb[2].mxu0 %vm263_vm2, %v250_v25  ;;  %v653_v48 = vsel %vm650_vm3, %v651_v45, %v652_v46  ;;  %v655_v50 = vsel %vm650_vm3, %v652_v46, %v654_v49  ;;  %v660_v55 = vrot.slane %v1809_v30, 2  ;;  %v662_v57 = vrot.slane %v1820_v33, 2 }
  0x25   : > { %1318 = vmatprep.mubr.msk.f32.mxu1 %vm1653_vm0, %v1654_v7  ;;  %1380 = vmatprep.mubr.msk.f32.mxu0 %vm1653_vm0, %v1654_v7  ;;  %v657_v52 = vsel %vm650_vm3, %v654_v49, %v656_v51  ;;  %v659_v54 = vsel %vm650_vm3, %v656_v51, %v658_v53  ;;  %v664_v59 = vrot.slane %v1831_v36, 2  ;;  %v666_v61 = vrot.slane %v1842_v39, 2  ;;  %p1559_p13 = pneg %p1558_p12 }
  0x26   : > { %v661_v56 = vsel %vm650_vm3, %v658_v53, %v660_v55  ;;  %v663_v58 = vsel %vm650_vm3, %v660_v55, %v662_v57  ;;  %v668_v63 = vrot.slane %v1853_v42, 2  ;;  %v844_v16 = vshrl.u32 %v1958_v9, 3 }
  0x27   : > { %v665_v60 = vsel %vm650_vm3, %v662_v57, %v664_v59  ;;  %v667_v62 = vsel %vm650_vm3, %v664_v59, %v666_v61  ;;  %v822_v17 = vadd.s32 32, %v818_v2  ;;  %v855_v18 = vshrl.u32 %v1961_v11, 3  ;;  %p1566_p3 = pnand %p1565_p2, %p1559_p13 }
  0x28   : > { %1319 = vmatmul.mubr.msk.f32.gmra.mrb[4].mxu1 %vm263_vm2, %v250_v25  ;;  %1381 = vmatmul.mubr.msk.f32.gmra.mrb[4].mxu0 %vm263_vm2, %v252_v28  ;;  %v669_v0 = vsel %vm650_vm3, %v666_v61, %v668_v63  ;;  %v1969_v19 = vadd.s32 40, %v818_v2  ;;  %v845_v21 = vmul.u32 9, %v844_v16  ;;  %v2006_v46 = vadd.s32 64, %v818_v2 }
  0x29   : > { %1321 = vmatprep.mubr.msk.f32.mxu1 %vm1653_vm0, %v1654_v7  ;;  %1383 = vmatprep.mubr.msk.f32.mxu0 %vm1653_vm0, %v1654_v7  ;;  %v856_v24 = vmul.u32 9, %v855_v18 }
  0x2a   : > { %v846_v29 = vsub.s32 %v819_v5, %v845_v21 }
  0x2b   : > { %v857_v32 = vsub.s32 %v820_v6, %v856_v24 }
  0x2c   : > { %1322 = vmatmul.mubr.msk.f32.gmra.mrb[6].mxu1 %vm263_vm2, %v252_v28  ;;  %1384 = vmatmul.mubr.msk.f32.gmra.mrb[6].mxu0 %vm263_vm2, %v254_v31  ;;  %v1979_v28 = vadd.s32 48, %v818_v2  ;;  %vm927_vm7 = vcmp.ne.s32.totalorder %v846_v29, 0  ;;  %vm936_vm8 = vcmp.lt.s32.totalorder %v846_v29, 0  ;;  %v954_v39 = vadd.s32 9, %v846_v29 }
  0x2d   : > { %1324 = vmatprep.mubr.msk.f32.mxu1 %vm1653_vm0, %v1654_v7  ;;  %1386 = vmatprep.mubr.msk.f32.mxu0 %vm1653_vm0, %v1654_v7  ;;  %vm1995_vm9 = vmand %vm936_vm8, %vm927_vm7  ;;  %vm928_vm10 = vcmp.ne.s32.totalorder %v857_v32, 0  ;;  %vm937_vm11 = vcmp.lt.s32.totalorder %v857_v32, 0  ;;  %v955_v53 = vadd.s32 9, %v857_v32 }
  0x2e   : > { %vm2023_vm14 = vmand %vm937_vm11, %vm928_vm10 }
  0x30   : > { %1325 = vmatmul.mubr.msk.f32.gmra.mrb[8].mxu1 %vm263_vm2, %v254_v31  ;;  %1387 = vmatmul.mubr.msk.f32.gmra.mrb[8].mxu0 %vm263_vm2, %v256_v34 }
  0x31   : > { %1327 = vmatprep.mubr.msk.f32.mxu1 %vm1653_vm0, %v1654_v7  ;;  %1389 = vmatprep.mubr.msk.f32.mxu0 %vm1653_vm0, %v1654_v7 }
  0x34   : > { %1328 = vmatmul.mubr.msk.f32.gmra.mrb[10].mxu1 %vm263_vm2, %v256_v34  ;;  %1390 = vmatmul.mubr.msk.f32.gmra.mrb[10].mxu0 %vm263_vm2, %v258_v37  ;;  %v1986_v34 = vmul.u32.u64.low 3817748708, %v1979_v28  ;;  %v1987_v35 = vmul.u32.u64.high 3817748708, %v1979_v28, %v1986_v34 }
  0x35   : > { %1330 = vmatprep.mubr.msk.f32.mxu1 %vm1653_vm0, %v1654_v7  ;;  %1392 = vmatprep.mubr.msk.f32.mxu0 %vm1653_vm0, %v1654_v7 }
  0x36   : > { %v899_v57 = vshrl.u32 %v1987_v35, 3 }
  0x38   : > { %1331 = vmatmul.mubr.msk.f32.gmra.mrb[12].mxu1 %vm263_vm2, %v258_v37  ;;  %1393 = vmatmul.mubr.msk.f32.gmra.mrb[12].mxu0 %vm263_vm2, %v260_v40  ;;  %v1990_v37 = vadd.s32 56, %v818_v2  ;;  %v900_v9 = vmul.u32 9, %v899_v57 }
  0x39   : > { %1333 = vmatprep.mubr.msk.f32.mxu1 %vm1653_vm0, %v1654_v7  ;;  %1395 = vmatprep.mubr.msk.f32.mxu0 %vm1653_vm0, %v1654_v7 }
  0x3a   : > { %v2003_v44 = vmul.u32.u64.low 3817748708, %v1990_v37  ;;  %v2004_v45 = vmul.u32.u64.high 3817748708, %v1990_v37, %v2003_v44 }
  0x3c   : > { %1334 = vmatmul.mubr.msk.f32.gmra.mrb[14].mxu1 %vm263_vm2, %v260_v40  ;;  %1396 = vmatmul.mubr.msk.f32.gmra.mrb[14].mxu0 %vm263_vm2, %v262_v43  ;;  %v910_v11 = vshrl.u32 %v2004_v45, 3 }
  0x3d   : > { %1336 = vmatprep.mubr.msk.f32.mxu1 %vm1653_vm0, %v1654_v7  ;;  %1398 = vmatprep.mubr.msk.f32.mxu0 %vm1653_vm0, %v1654_v7 }
  0x40   : > { %1337 = vmatmul.mubr.msk.f32.gmra.mrb[16].mxu1 %vm263_vm2, %v262_v43  ;;  %1399 = vmatmul.mubr.msk.f32.gmra.mrb[16].mxu0 %vm263_vm2, %v525_v47 }
  0x41   : > { %1343 = vmatprep.mubr.msk.f32.mxu1 %vm1653_vm0, %v1654_v7  ;;  %1405 = vmatprep.mubr.msk.f32.mxu0 %vm1653_vm0, %v1654_v7 }
  0x44   : > { %1344 = vmatmul.mubr.msk.f32.vlgmr.msra.gmra.mrb[0].mxu1 %vm263_vm2, %v1769_v12  ;;  %1406 = vmatmul.mubr.msk.f32.vlgmr.msra.gmra.mrb[0].mxu0 %vm263_vm2, %v653_v48  ;;  %v833_v12 = vshrl.u32 %v1955_v4, 3  ;;  %v964_v4 = vsel %vm2023_vm14, %v955_v53, %v857_v32 }
  0x45   : > { %1346 = vmatprep.mubr.msk.f32.mxu1 %vm1653_vm0, %v1654_v7  ;;  %1408 = vmatprep.mubr.msk.f32.mxu0 %vm1653_vm0, %v1654_v7 }
  0x48   : > { %1347 = vmatmul.mubr.msk.f32.gmra.mrb[2].mxu1 %vm263_vm2, %v1772_v13  ;;  %1409 = vmatmul.mubr.msk.f32.gmra.mrb[2].mxu0 %vm263_vm2, %v655_v50 }
  0x49   : > { %1349 = vmatprep.mubr.msk.f32.mxu1 %vm1653_vm0, %v1654_v7  ;;  %1411 = vmatprep.mubr.msk.f32.mxu0 %vm1653_vm0, %v1654_v7 }
  0x4c   : > { %1350 = vmatmul.mubr.msk.f32.gmra.mrb[4].mxu1 %vm263_vm2, %v1775_v15  ;;  %1412 = vmatmul.mubr.msk.f32.gmra.mrb[4].mxu0 %vm263_vm2, %v657_v52  ;;  %v834_v15 = vmul.u32 9, %v833_v12  ;;  %v963_v52 = vsel %vm1995_vm9, %v954_v39, %v846_v29 }
  0x4d   : > { %1352 = vmatprep.mubr.msk.f32.mxu1 %vm1653_vm0, %v1654_v7  ;;  %1414 = vmatprep.mubr.msk.f32.mxu0 %vm1653_vm0, %v1654_v7  ;;  %vm2037_vm1 = vcmp.lt.s32.totalorder %v963_v52, 8 }
  0x50   : > { %1353 = vmatmul.mubr.msk.f32.gmra.mrb[6].mxu1 %vm263_vm2, %v1781_v20  ;;  %1415 = vmatmul.mubr.msk.f32.gmra.mrb[6].mxu0 %vm263_vm2, %v659_v54  ;;  %v835_v20 = vsub.s32 %v818_v2, %v834_v15 }
  0x51   : > { %1355 = vmatprep.mubr.msk.f32.mxu1 %vm1653_vm0, %v1654_v7  ;;  %1417 = vmatprep.mubr.msk.f32.mxu0 %vm1653_vm0, %v1654_v7 }
  0x52   : > { %vm926_vm4 = vcmp.ne.s32.totalorder %v835_v20, 0  ;;  %vm935_vm5 = vcmp.lt.s32.totalorder %v835_v20, 0 }
  0x53   : > { %vm1981_vm6 = vmand %vm935_vm5, %vm926_vm4  ;;  %vm2067_vm5 = vcmp.lt.s32.totalorder %v964_v4, 8 }
  0x54   : > { %1356 = vmatmul.mubr.msk.f32.gmra.mrb[8].mxu1 %vm263_vm2, %v1785_v22  ;;  %1418 = vmatmul.mubr.msk.f32.gmra.mrb[8].mxu0 %vm263_vm2, %v661_v56  ;;  %v1971_v22 = vmul.u32.u64.low 3817748708, %v822_v17  ;;  %v1972_v23 = vmul.u32.u64.high 3817748708, %v822_v17, %v1971_v22 }
  0x55   : > { %1358 = vmatprep.mubr.msk.f32.mxu1 %vm1653_vm0, %v1654_v7  ;;  %1420 = vmatprep.mubr.msk.f32.mxu0 %vm1653_vm0, %v1654_v7 }
  0x58   : > { %1359 = vmatmul.mubr.msk.f32.gmra.mrb[10].mxu1 %vm263_vm2, %v1798_v27  ;;  %1421 = vmatmul.mubr.msk.f32.gmra.mrb[10].mxu0 %vm263_vm2, %v663_v58  ;;  %v1976_v26 = vmul.u32.u64.low 3817748708, %v1969_v19  ;;  %v1977_v27 = vmul.u32.u64.high 3817748708, %v1969_v19, %v1976_v26 }
  0x59   : > { %1361 = vmatprep.mubr.msk.f32.mxu1 %vm1653_vm0, %v1654_v7  ;;  %1423 = vmatprep.mubr.msk.f32.mxu0 %vm1653_vm0, %v1654_v7 }
  0x5a   : > { %v888_v42 = vshrl.u32 %v1977_v27, 3 }
  0x5c   : > { %1362 = vmatmul.mubr.msk.f32.gmra.mrb[12].mxu1 %vm263_vm2, %v1809_v30  ;;  %1424 = vmatmul.mubr.msk.f32.gmra.mrb[12].mxu0 %vm263_vm2, %v665_v60  ;;  %v953_v30 = vadd.s32 9, %v835_v20  ;;  %v889_v56 = vmul.u32 9, %v888_v42  ;;  %v2034_v59 = vmul.u32.u64.low 3817748708, %v2006_v46  ;;  %v2035_v60 = vmul.u32.u64.high 3817748708, %v2006_v46, %v2034_v59 }
  0x5d   : > { %1364 = vmatprep.mubr.msk.f32.mxu1 %vm1653_vm0, %v1654_v7  ;;  %1426 = vmatprep.mubr.msk.f32.mxu0 %vm1653_vm0, %v1654_v7 }
  0x5e   : > { %v962_v38 = vsel %vm1981_vm6, %v953_v30, %v835_v20  ;;  %v2056_v8 = vsub.s32 %v1969_v19, %v889_v56  ;;  %v921_v26 = vshrl.u32 %v2035_v60, 3 }
  0x5f   : > { %vm2017_vm13 = vcmp.lt.s32.totalorder %v962_v38, 8 }
  0x60   : > { %1365 = vmatmul.mubr.msk.f32.gmra.mrb[14].mxu1 %vm263_vm2, %v1820_v33  ;;  %1427 = vmatmul.mubr.msk.f32.gmra.mrb[14].mxu0 %vm263_vm2, %v667_v62  ;;  %vm931_vm7 = vcmp.ne.s32.totalorder %v2056_v8, 0  ;;  %vm940_vm8 = vcmp.lt.s32.totalorder %v2056_v8, 0 }
  0x61   : > { %1367 = vmatprep.mubr.msk.f32.mxu1 %vm1653_vm0, %v1654_v7  ;;  %1429 = vmatprep.mubr.msk.f32.mxu0 %vm1653_vm0, %v1654_v7  ;;  %v821_v7 = vadd.s32 24, %v818_v2  ;;  %vm2103_vm10 = vmand %vm940_vm8, %vm931_vm7 }
  0x63   : > { %v1964_v13 = vmul.u32.u64.low 3817748708, %v821_v7  ;;  %v1965_v14 = vmul.u32.u64.high 3817748708, %v821_v7, %v1964_v13 }
  0x64   : > { %1368 = vmatmul.mubr.msk.f32.gmra.mrb[16].mxu1 %vm263_vm2, %v1831_v36  ;;  %1430 = vmatmul.mubr.msk.f32.gmra.mrb[16].mxu0 %vm263_vm2, %v669_v0  ;;  %v877_v36 = vshrl.u32 %v1972_v23, 3  ;;  %v901_v23 = vsub.s32 %v1979_v28, %v900_v9 }
  0x65   : > { %v866_v25 = vshrl.u32 %v1965_v14, 3 }
  0x66   : > { %v878_v43 = vmul.u32 9, %v877_v36  ;;  %v958_v36 = vadd.s32 9, %v2056_v8  ;;  %vm932_vm11 = vcmp.ne.s32.totalorder %v901_v23, 0  ;;  %vm941_vm14 = vcmp.lt.s32.totalorder %v901_v23, 0 }
  0x67   : > { %v867_v33 = vmul.u32 9, %v866_v25  ;;  %v911_v25 = vmul.u32 9, %v910_v11  ;;  %v959_v53 = vadd.s32 9, %v901_v23 }
  0x68   : > { %v879_v58 = vsub.s32 %v822_v17, %v878_v43  ;;  %v967_v52 = vsel %vm2103_vm10, %v958_v36, %v2056_v8 }
  0x69   : > { %v1999_v41 = vsub.s32 %v821_v7, %v867_v33  ;;  %v912_v40 = vsub.s32 %v1990_v37, %v911_v25 }
  0x6a   : > { %vm930_vm3 = vcmp.ne.s32.totalorder %v879_v58, 0  ;;  %vm939_vm4 = vcmp.lt.s32.totalorder %v879_v58, 0  ;;  %v957_v21 = vadd.s32 9, %v879_v58 }
  0x6b   : > { %vm929_vm15 = vcmp.ne.s32.totalorder %v1999_v41, 0  ;;  %vm938_vm0 = vcmp.lt.s32.totalorder %v1999_v41, 0  ;;  %v956_v5 = vadd.s32 9, %v1999_v41  ;;  %vm2077_vm6 = vmand %vm939_vm4, %vm930_vm3  ;;  %vm942_vm3 = vcmp.lt.s32.totalorder %v912_v40, 0 }
  0x6c   : > { %vm2051_vm2 = vmand %vm938_vm0, %vm929_vm15  ;;  %v966_v35 = vsel %vm2077_vm6, %v957_v21, %v879_v58  ;;  %vm2137_vm4 = vcmp.lt.s32.totalorder %v967_v52, 8  ;;  %v960_v4 = vadd.s32 9, %v912_v40 }
  0x6d   : > { %v965_v20 = vsel %vm2051_vm2, %v956_v5, %v1999_v41  ;;  %v922_v41 = vmul.u32 9, %v921_v26  ;;  %vm2115_vm15 = vcmp.lt.s32.totalorder %v966_v35, 8  ;;  %vm2125_vm0 = vmand %vm941_vm14, %vm932_vm11  ;;  %vm933_vm2 = vcmp.ne.s32.totalorder %v912_v40, 0 }
  0x6e   : > { %vm2092_vm9 = vcmp.lt.s32.totalorder %v965_v20, 8  ;;  %vm2145_vm6 = vmand %vm942_vm3, %vm933_vm2  ;;  %vm1031_vm2 = vcmask 57344  }
  0x6f   : > { %v923_v56 = vsub.s32 %v2006_v46, %v922_v41 }
  0x71   : > { %vm934_vm7 = vcmp.ne.s32.totalorder %v923_v56, 0  ;;  %vm943_vm8 = vcmp.lt.s32.totalorder %v923_v56, 0 }
  0x72   : > { %vm2164_vm11 = vmand %vm943_vm8, %vm934_vm7 }
 0x117   : > { %v476_v47 = vpop.f32.mrb[0].mxu1  ;;  %v754_v48 = vpop.f32.mrb[0].mxu0 }
 0x118   : > { %v2013_v49 = vadd.f32 %v754_v48, %v476_v47  ;;  %v1345_v50 = vpop.f32.mrb[1].mxu1  ;;  %v1407_v51 = vpop.f32.mrb[1].mxu0 }
 0x11a   : > { %808 = vst.msk [vmem:[%s2011_s8] sm:$0xff] %vm807_vm12, %v2013_v49  ;;  %v980_v0 = vsel %vm2017_vm13, %v2013_v49, 0.0 }
 0x11b   : > { %v481_v61 = vpop.f32.mrb[2].mxu1  ;;  %v759_v62 = vpop.f32.mrb[2].mxu0  ;;  %v989_v7 = vsel %vm807_vm12, %v980_v0, 0.0 }
 0x11c   : > { %v2044_v1 = vadd.f32 %v759_v62, %v481_v61  ;;  %v1348_v2 = vpop.f32.mrb[3].mxu1  ;;  %v1410_v3 = vpop.f32.mrb[3].mxu0 }
 0x11d   : > { %v968_v3 = vsel %vm2125_vm0, %v959_v53, %v901_v23 }
 0x11e   : > { %809 = vst.msk [vmem:[%s2011_s8 + $0x8] sm:$0xff] %vm807_vm12, %v2044_v1  ;;  %v981_v10 = vsel %vm2037_vm1, %v2044_v1, 0.0  ;;  %vm2156_vm10 = vcmp.lt.s32.totalorder %v968_v3, 8 }
 0x11f   : > { %v990_v12 = vsel %vm807_vm12, %v981_v10, 0.0  ;;  %v486_v13 = vpop.f32.mrb[4].mxu1  ;;  %v764_v14 = vpop.f32.mrb[4].mxu0 }
 0x120   : > { %v991_v16 = vadd.f32 %v990_v12, %v989_v7  ;;  %v2071_v17 = vadd.f32 %v764_v14, %v486_v13  ;;  %v1351_v18 = vpop.f32.mrb[5].mxu1  ;;  %v1413_v19 = vpop.f32.mrb[5].mxu0  ;;  %v969_v14 = vsel %vm2145_vm6, %v960_v4, %v912_v40 }
 0x121   : > { %vm2175_vm14 = vcmp.lt.s32.totalorder %v969_v14, 8 }
 0x122   : > { %810 = vst.msk [vmem:[%s2011_s8 + $0x10] sm:$0xff] %vm807_vm12, %v2071_v17  ;;  %v982_v24 = vsel %vm2067_vm5, %v2071_v17, 0.0 }
 0x123   : > { %v992_v27 = vsel %vm807_vm12, %v982_v24, 0.0  ;;  %v491_v29 = vpop.f32.mrb[6].mxu1  ;;  %v769_v30 = vpop.f32.mrb[6].mxu0 }
 0x124   : > { %v993_v28 = vadd.f32 %v992_v27, %v991_v16  ;;  %v2096_v32 = vadd.f32 %v769_v30, %v491_v29  ;;  %v1354_v33 = vpop.f32.mrb[7].mxu1  ;;  %v1416_v34 = vpop.f32.mrb[7].mxu0  ;;  %v961_v16 = vadd.s32 9, %v923_v56 }
 0x126   : > { %811 = vst.msk [vmem:[%s2011_s8 + $0x18] sm:$0xff] %vm807_vm12, %v2096_v32  ;;  %v983_v39 = vsel %vm2092_vm9, %v2096_v32, 0.0  ;;  %v970_v29 = vsel %vm2164_vm11, %v961_v16, %v923_v56 }
 0x127   : > { %v994_v42 = vsel %vm807_vm12, %v983_v39, 0.0  ;;  %v496_v43 = vpop.f32.mrb[8].mxu1  ;;  %v774_v44 = vpop.f32.mrb[8].mxu0  ;;  %vm2190_vm0 = vcmp.lt.s32.totalorder %v970_v29, 8 }
 0x128   : > { %v995_v47 = vadd.f32 %v994_v42, %v993_v28  ;;  %v2119_v48 = vadd.f32 %v774_v44, %v496_v43  ;;  %v1357_v50 = vpop.f32.mrb[9].mxu1  ;;  %v1419_v51 = vpop.f32.mrb[9].mxu0 }
 0x12a   : > { %812 = vst.msk [vmem:[%s2011_s8 + $0x20] sm:$0xff] %vm807_vm12, %v2119_v48  ;;  %v984_v55 = vsel %vm2115_vm15, %v2119_v48, 0.0 }
 0x12b   : > { %v996_v57 = vsel %vm807_vm12, %v984_v55, 0.0  ;;  %v501_v58 = vpop.f32.mrb[10].mxu1  ;;  %v779_v59 = vpop.f32.mrb[10].mxu0 }
 0x12c   : > { %v997_v61 = vadd.f32 %v996_v57, %v995_v47  ;;  %v2141_v62 = vadd.f32 %v779_v59, %v501_v58  ;;  %v1360_v0 = vpop.f32.mrb[11].mxu1  ;;  %v1422_v2 = vpop.f32.mrb[11].mxu0 }
 0x12e   : > { %813 = vst.msk [vmem:[%s2011_s8 + $0x28] sm:$0xff] %vm807_vm12, %v2141_v62  ;;  %v985_v46 = vsel %vm2137_vm4, %v2141_v62, 0.0 }
 0x12f   : > { %v998_v6 = vsel %vm807_vm12, %v985_v46, 0.0  ;;  %v506_v8 = vpop.f32.mrb[12].mxu1  ;;  %v784_v9 = vpop.f32.mrb[12].mxu0 }
 0x130   : > { %v999_v11 = vadd.f32 %v998_v6, %v997_v61  ;;  %v2160_v7 = vadd.f32 %v784_v9, %v506_v8  ;;  %v1363_v12 = vpop.f32.mrb[13].mxu1  ;;  %v1425_v13 = vpop.f32.mrb[13].mxu0 }
 0x132   : > { %814 = vst.msk [vmem:[%s2011_s8 + $0x30] sm:$0xff] %vm807_vm12, %v2160_v7  ;;  %v986_v19 = vsel %vm2156_vm10, %v2160_v7, 0.0 }
 0x133   : > { %v1000_v20 = vsel %vm807_vm12, %v986_v19, 0.0  ;;  %v511_v21 = vpop.f32.mrb[14].mxu1  ;;  %v789_v22 = vpop.f32.mrb[14].mxu0 }
 0x134   : > { %v1001_v24 = vadd.f32 %v1000_v20, %v999_v11  ;;  %v2179_v25 = vadd.f32 %v789_v22, %v511_v21  ;;  %v1366_v26 = vpop.f32.mrb[15].mxu1  ;;  %v1428_v27 = vpop.f32.mrb[15].mxu0 }
 0x136   : > { %815 = vst.msk [vmem:[%s2011_s8 + $0x38] sm:$0xff] %vm807_vm12, %v2179_v25  ;;  %v987_v30 = vsel %vm2175_vm14, %v2179_v25, 0.0 }
 0x137   : > { %v1002_v28 = vsel %vm807_vm12, %v987_v30, 0.0  ;;  %v516_v33 = vpop.f32.mrb[16].mxu1  ;;  %v794_v34 = vpop.f32.mrb[16].mxu0 }
 0x138   : > { %v1003_v36 = vadd.f32 %v1002_v28, %v1001_v24  ;;  %v2194_v38 = vadd.f32 %v794_v34, %v516_v33  ;;  %v1369_v39 = vpop.f32.mrb[17].mxu1  ;;  %v1431_v40 = vpop.f32.mrb[17].mxu0 }
 0x13a   : > { %816 = vst.msk [vmem:[%s2011_s8 + $0x40] sm:$0xff] %vm807_vm12, %v2194_v38  ;;  %v988_v41 = vsel %vm2190_vm0, %v2194_v38, 0.0 }
 0x13b   : > { %v1004_v42 = vsel %vm807_vm12, %v988_v41, 0.0 }
 0x13c   : > { %v1005_v43 = vadd.f32 %v1004_v42, %v1003_v36 }
 0x13e   : > { %v1006_v44 = vrot.slane %v1005_v43, 4 }
 0x140   : > { %v1007_v47 = vadd.f32 %v1006_v44, %v1005_v43 }
 0x142   : > { %v1008_v50 = vrot.slane %v1007_v47, 2 }
 0x144   : > { %v1009_v51 = vadd.f32 %v1008_v50, %v1007_v47 }
 0x146   : > { %v1010_v52 = vrot.slane %v1009_v51, 1 }
 0x148   : > { %v1011_v53 = vadd.f32 %v1010_v52, %v1009_v51 }
 0x14a   : > { %v1012_v37 = vmul.f32 0.015625, %v1011_v53  ;;  %1032 = vst.msk [vmem:[%s200_s11] sm:$0x1] %vm1031_vm2, %v1011_v53 }
 0x14b   : > { %1569 = shalt.err (!%p1566_p3)
}
 0x14c   : > { %s1570_s30 = scalar_lea.hbm %s2213_s20, 16  ;;  %s1574_s7 = scalar_lea.hbm %s2329_s3, 32 }
 0x14d   : > { %p1571_p4 = scmp.ne.s32.totalorder %s2213_s20, %s1570_s30  ;;  %p1575_p9 = scmp.lt.u32.totalorder %s2213_s20, %s2329_s3 }
 0x14e   : > { %p1576_p10 = scmp.lt.u32.totalorder %s1574_s7, %s1570_s30  ;;  %p1578_p12 = scmp.lt.u32.totalorder %s1570_s30, %s2213_s20 }
 0x14f   : > { %p1572_p7 = pnand %p1571_p4, %p1720_p5 }
 0x150   : > { %p1577_p11 = por %p1576_p10, %p1575_p9 }
 0x151   : > { %p1573_p8 = pneg %p1572_p7 }
 0x152   : > { %p1579_p13 = por %p1578_p12, %p1577_p11 }
 0x154   : > { %p1580_p0 = pnand %p1579_p13, %p1573_p8 }
 0x156   : > { %1583 = shalt.err (!%p1580_p0)
}
 0x157   : > { %1509 = dma.vmem_to_hbm [thread:$0]  (%p1720_p5), %s2215_s12, 16, %s2213_s20, %s1072_s22   ;;  %v1013_v55 = vsub.f32 %v2013_v49, %v1012_v37  ;;  %v1014_v56 = vsub.f32 %v2044_v1, %v1012_v37  ;;  %v1015_v57 = vsub.f32 %v2071_v17, %v1012_v37  ;;  %v1016_v58 = vsub.f32 %v2096_v32, %v1012_v37 }
 0x158   : > { %v1017_v59 = vsub.f32 %v2119_v48, %v1012_v37  ;;  %v1018_v61 = vsub.f32 %v2141_v62, %v1012_v37  ;;  %v1019_v0 = vsub.f32 %v2160_v7, %v1012_v37  ;;  %v1020_v2 = vsub.f32 %v2179_v25, %v1012_v37  ;;  %s206_s12 = scalar_lea.vmem [#allocation4], %s2204_s9  ;;  %s2282_s22 = scalar_lea.hbm %s2330_s4, %s1260_s10 }
 0x159   : > { %v1021_v3 = vsub.f32 %v2194_v38, %v1012_v37  ;;  %v1022_v4 = vsel %vm2017_vm13, %v1013_v55, 0.0  ;;  %v1023_v49 = vsel %vm2037_vm1, %v1014_v56, 0.0  ;;  %v1024_v1 = vsel %vm2067_vm5, %v1015_v57, 0.0  ;;  %s1104_s13 = sshll.u32 %s206_s12, 4  ;;  %s1076_s23 = scalar_lea.sflag [#allocation5], %s2204_s9  ;;  %s2284_s13 = int_to_ptr.vmem [resolvable:$true] %s1104_s13 }
 0x15a   : > { %v1025_v17 = vsel %vm2092_vm9, %v1016_v58, 0.0  ;;  %v1027_v32 = vsel %vm2137_vm4, %v1018_v61, 0.0  ;;  %v1028_v48 = vsel %vm2156_vm10, %v1019_v0, 0.0  ;;  %v1029_v62 = vsel %vm2175_vm14, %v1020_v2, 0.0  ;;  %s1584_s27 = scalar_lea.vmem %s2284_s13, 16  ;;  %s1656_s28 = smov [#allocation4]  }
 0x15b   : > { %v1030_v54 = vsel %vm2190_vm0, %v1021_v3, 0.0  ;;  %v1033_v63 = vmul.f32 %v1022_v4, %v1022_v4  ;;  %v1034_v5 = vmul.f32 %v1023_v49, %v1023_v49  ;;  %v1026_v15 = vsel %vm2115_vm15, %v1017_v59, 0.0  ;;  %p1585_p1 = scmp.ne.s32.totalorder %s2284_s13, %s1584_s27  ;;  %s1588_s19 = sshll.u32 %s1656_s28, 4  ;;  %s1589_s19 = int_to_ptr.vmem [resolvable:$false] %s1588_s19 }
 0x15c   : > { %v1035_v46 = vmul.f32 %v1024_v1, %v1024_v1  ;;  %v1038_v31 = vmul.f32 %v1027_v32, %v1027_v32  ;;  %v1039_v6 = vmul.f32 %v1028_v48, %v1028_v48  ;;  %v1040_v8 = vmul.f32 %v1029_v62, %v1029_v62  ;;  %s1590_s29 = scalar_lea.vmem %s1589_s19, 32  ;;  %p1591_p4 = scmp.lt.s32.totalorder %s2284_s13, %s1589_s19 }
 0x15d   : > { %v1041_v60 = vmul.f32 %v1030_v54, %v1030_v54  ;;  %v1042_v9 = vsel %vm807_vm12, %v1033_v63, 0.0  ;;  %v1036_v10 = vmul.f32 %v1025_v17, %v1025_v17  ;;  %v1043_v11 = vsel %vm807_vm12, %v1034_v5, 0.0  ;;  %p1586_p2 = pnand %p1585_p1, %p1720_p5  ;;  %p1592_p7 = scmp.lt.s32.totalorder %s1590_s29, %s1584_s27 }
 0x15e   : > { %v1044_v7 = vadd.f32 %v1043_v11, %v1042_v9  ;;  %v1051_v12 = vsel %vm807_vm12, %v1038_v31, 0.0  ;;  %v1053_v13 = vsel %vm807_vm12, %v1039_v6, 0.0  ;;  %v1055_v14 = vsel %vm807_vm12, %v1040_v8, 0.0 }
 0x15f   : > { %v1037_v16 = vmul.f32 %v1026_v15, %v1026_v15  ;;  %v1045_v45 = vsel %vm807_vm12, %v1035_v46, 0.0  ;;  %v1057_v18 = vsel %vm807_vm12, %v1041_v60, 0.0  ;;  %v1047_v20 = vsel %vm807_vm12, %v1036_v10, 0.0  ;;  %p1587_p3 = pneg %p1586_p2  ;;  %p1593_p8 = por %p1592_p7, %p1591_p4 }
 0x160   : > { %v1046_v19 = vadd.f32 %v1045_v45, %v1044_v7 }
 0x161   : > { %v1049_v22 = vsel %vm807_vm12, %v1037_v16, 0.0  ;;  %p1594_p9 = pnand %p1593_p8, %p1587_p3 }
 0x162   : > { %v1048_v21 = vadd.f32 %v1047_v20, %v1046_v19 }
 0x164   : > { %v1050_v23 = vadd.f32 %v1049_v22, %v1048_v21 }
 0x166   : > { %v1052_v24 = vadd.f32 %v1051_v12, %v1050_v23 }
 0x168   : > { %v1054_v25 = vadd.f32 %v1053_v13, %v1052_v24 }
 0x16a   : > { %v1056_v26 = vadd.f32 %v1055_v14, %v1054_v25 }
 0x16c   : > { %v1058_v27 = vadd.f32 %v1057_v18, %v1056_v26 }
 0x16e   : > { %v1059_v29 = vrot.slane %v1058_v27, 4 }
 0x170   : > { %v1060_v30 = vadd.f32 %v1059_v29, %v1058_v27 }
 0x172   : > { %v1061_v28 = vrot.slane %v1060_v30, 2 }
 0x174   : > { %v1062_v33 = vadd.f32 %v1061_v28, %v1060_v30 }
 0x176   : > { %v1063_v34 = vrot.slane %v1062_v33, 1 }
 0x178   : > { %v1064_v35 = vadd.f32 %v1063_v34, %v1062_v33 }
 0x17a   : > { %1065 = vst.msk [vmem:[%s206_s12] sm:$0x1] %vm1031_vm2, %v1064_v35 }
 0x17b   : > { %1597 = shalt.err (!%p1594_p9)
}
 0x17c   : > { %s1598_s9 = scalar_lea.hbm %s2282_s22, 16  ;;  %s1602_s5 = scalar_lea.hbm %s2330_s4, 32 }
 0x17d   : > { %p1599_p10 = scmp.ne.s32.totalorder %s2282_s22, %s1598_s9  ;;  %p1603_p13 = scmp.lt.u32.totalorder %s2282_s22, %s2330_s4 }
 0x17e   : > { %p1604_p0 = scmp.lt.u32.totalorder %s1602_s5, %s1598_s9  ;;  %p1606_p2 = scmp.lt.u32.totalorder %s1598_s9, %s2282_s22 }
 0x17f   : > { %p1600_p11 = pnand %p1599_p10, %p1720_p5 }
 0x180   : > { %p1605_p1 = por %p1604_p0, %p1603_p13 }
 0x181   : > { %p1601_p12 = pneg %p1600_p11 }
 0x182   : > { %p1607_p3 = por %p1606_p2, %p1605_p1 }
 0x184   : > { %p1608_p4 = pnand %p1607_p3, %p1601_p12 }
 0x186   : > { %1611 = shalt.err (!%p1608_p4)
}
 0x187   : > { %1510 = dma.vmem_to_hbm [thread:$0]  (%p1720_p5), %s2284_s13, 16, %s2282_s22, %s1076_s23  }
 0x188 PF: > { %p1520_p7 = scmp.ge.s32.totalorder %s1650_s18, 2  ;;  %s1124_s8 = sand.u32 1, %s1638_s15  }
 0x189   : > { %s1125_s11 = scalar_lea.sflag [#allocation3], %s1124_s8 }
 0x18a   : > { %p1514_p8 = pnand %p1520_p7, %p1724_p6 }
 0x18c   : > { %1629 = dma.done.wait (!%p1514_p8), %s1125_s11, 16  }
 0x18d   : > { %1631 = vsyncadd (!%p1514_p8), %s1125_s11, 4294967280  ;;  %s1133_s12 = scalar_lea.sflag [#allocation5], %s1124_s8 }
 0x18e   : > { %1633 = dma.done.wait (!%p1514_p8), %s1133_s12, 16  }
 0x18f   : > { %1635 = vsyncadd (!%p1514_p8), %s1133_s12, 4294967280  ;;  %p18_p5 = scmp.ge.s32.totalorder %s1707_s21, 4   ;;  %s2369_s15 = smov %s1642_s16 }
 0x190   : > { %s2370_s16 = smov %s1646_s17  ;;  %s2371_s17 = smov %s1718_s24 }
 0x191   : > { %s2372_s18 = smov %s1707_s21  ;;  %20 = sbr.rel (!%p18_p5) target bundleno = 5 (0x5), region = 95 }
 0x198   :  { %1137 = vsyncpa [#allocation3], 1 }
 0x199   :  { %1139 = vsyncpa [#allocation3 + $0x1], 1 }
 0x19a   :  { %1140 = vsyncpa [#allocation5], 1 }
 0x19b   :  { %1142 = vsyncpa [#allocation5 + $0x1], 1 }

</bundles_post_ra>
